<compile_context>
chip_gen: v5e
topology: v5e:2x2
jax: 0.10.0
libtpu: 0.0.40
codegen_flags: <defaults>
</compile_context>

<pallas_src>
import math
import functools

import jax
import jax.numpy as jnp
from jax.experimental import pallas as pl
from jax.experimental.pallas import tpu as pltpu

_LANE = 128      # lane width (last-dim tiling unit)
_SUBLANE = 8     # sublane width (second-to-last dim tiling unit)


def _round_up(x, m):
    return (x + m - 1) // m * m


def _sine_layer_kernel(x_ref, wt_ref, b_ref, o_ref, acc_ref):
    # x_ref:   (tm, tk)        tile of input rows
    # wt_ref:  (tk, D_out_p)   K-slab of the (transposed, omega-scaled) weight
    # b_ref:   (1, D_out_p)    omega-scaled bias row
    # o_ref:   (tm, D_out_p)   output tile
    # acc_ref: (tm, D_out_p)   f32 accumulator scratch (persists across K steps)
    k = pl.program_id(1)

    @pl.when(k == 0)
    def _():
        acc_ref[...] = jnp.zeros_like(acc_ref)

    acc_ref[...] += jnp.dot(x_ref[...], wt_ref[...],
                            preferred_element_type=jnp.float32)

    @pl.when(k == pl.num_programs(1) - 1)
    def _():
        # omega_0 already folded into wt/b on the host.
        o_ref[...] = jnp.sin(acc_ref[...] + b_ref[...]).astype(o_ref.dtype)


def _pick_tm(M):
    """Largest power-of-two row tile <= 512 that still leaves >= ~4 grid steps."""
    target = max(_SUBLANE, pl.cdiv(M, 4))
    for cand in (512, 256, 128, 64, 32, 16, 8):
        if cand <= target:
            return cand
    return _SUBLANE


def _pick_tk(d_in_p, d_out_p, itemsize):
    """Keep the full padded weight resident when small; otherwise K-tile it."""
    if d_in_p * d_out_p * itemsize <= 8 * 1024 * 1024:   # resident fast path
        return d_in_p
    for cand in (512, 256, 128):
        if d_in_p % cand == 0:
            return cand
    return d_in_p  # unreachable (d_in_p is a multiple of 128)


def sine_layer_forward(x, weight, bias=None, omega_0=30.0, *, tm=None, use_bf16=False):
    """Pallas implementation of SineLayer.forward.

    x:      (B, N, D_in) or (M, D_in)
    weight: (D_out, D_in)   (PyTorch nn.Linear layout)
    bias:   (D_out,) or None
    """
    orig_ndim = x.ndim
    if orig_ndim == 3:
        b_dim, n_dim, d = x.shape
        x2d = x.reshape(-1, d)
    else:
        x2d = x

    M, D_in = x2d.shape
    D_out = weight.shape[0]
    out_dtype = x.dtype

    if bias is None:
        bias = jnp.zeros((D_out,), weight.dtype)

    # Fold omega_0 into the transposed weight and bias:
    #   sin(omega*(x @ W.T + b)) == sin(x @ (omega*W.T) + omega*b)
    omega = jnp.asarray(omega_0, jnp.float32)
    wt = (weight.astype(jnp.float32).T * omega)            # (D_in, D_out)
    b_row = (bias.astype(jnp.float32) * omega).reshape(1, D_out)

    # Zero-pad feature dims to 128-lane multiples (lane-dense MXU operands / stores).
    D_in_p = _round_up(D_in, _LANE)
    D_out_p = _round_up(D_out, _LANE)
    if D_in_p != D_in:
        x2d = jnp.pad(x2d, ((0, 0), (0, D_in_p - D_in)))
        wt = jnp.pad(wt, ((0, D_in_p - D_in), (0, 0)))
    if D_out_p != D_out:
        wt = jnp.pad(wt, ((0, 0), (0, D_out_p - D_out)))
        b_row = jnp.pad(b_row, ((0, 0), (0, D_out_p - D_out)))

    if use_bf16:
        # Halves x/W DMA bytes and doubles MXU throughput; accumulation stays f32.
        x2d = x2d.astype(jnp.bfloat16)
        wt = wt.astype(jnp.bfloat16)

    # Row tile: big (up to 512), multiple of 8; no explicit row padding (ragged
    # last block is masked by Pallas, and rows are independent so that's safe).
    if tm is None:
        tm = _pick_tm(M)
    tm = max(_SUBLANE, _round_up(int(tm), _SUBLANE))

    itemsize = jnp.dtype(wt.dtype).itemsize
    tk = _pick_tk(D_in_p, D_out_p, itemsize)
    k_tiles = D_in_p // tk
    grid = (pl.cdiv(M, tm), k_tiles)

    # VMEM budget estimate (double-buffered tiles + accumulator); only raise the
    # scoped-VMEM limit when the default (16 MiB on v5e) would be too tight.
    out_itemsize = jnp.dtype(out_dtype).itemsize
    est = (2 * tm * tk * itemsize               # x tiles (double-buffered)
           + 2 * tk * D_out_p * itemsize        # weight slabs
           + 2 * tm * D_out_p * out_itemsize    # output tiles
           + 2 * D_out_p * 4                    # bias
           + tm * D_out_p * 4)                  # f32 accumulator scratch
    vmem_limit = None
    if est > 24 * 1024 * 1024:
        vmem_limit = int(min(est + (8 << 20), 96 << 20))

    out = pl.pallas_call(
        _sine_layer_kernel,
        out_shape=jax.ShapeDtypeStruct((M, D_out_p), out_dtype),
        grid_spec=pltpu.PrefetchScalarGridSpec(
            num_scalar_prefetch=0,
            grid=grid,
            in_specs=[
                pl.BlockSpec((tm, tk), lambda i, k: (i, k)),        # x tile
                pl.BlockSpec((tk, D_out_p), lambda i, k: (k, 0)),   # weight K-slab
                pl.BlockSpec((1, D_out_p), lambda i, k: (0, 0)),    # bias row
            ],
            out_specs=pl.BlockSpec((tm, D_out_p), lambda i, k: (i, 0)),
            scratch_shapes=[pltpu.VMEM((tm, D_out_p), jnp.float32)],
        ),
        compiler_params=pltpu.CompilerParams(
            dimension_semantics=("parallel", "arbitrary"),
            vmem_limit_bytes=vmem_limit),
    )(x2d, wt, b_row)

    if D_out_p != D_out:
        out = out[:, :D_out]
    if orig_ndim == 3:
        out = out.reshape(b_dim, n_dim, D_out)
    return out


def init_sine_layer_params(key, in_features, out_features, is_first=False,
                           omega_0=30.0, dtype=jnp.float32):
    """Deterministic init matching SineLayer.init_weights (synthetic, no checkpoint)."""
    kw, kb = jax.random.split(key)
    if is_first:
        bound_w = 1.0 / in_features
    else:
        bound_w = math.sqrt(6.0 / in_features) / omega_0
    weight = jax.random.uniform(kw, (out_features, in_features),
                                minval=-bound_w, maxval=bound_w, dtype=dtype)
    # nn.Linear default bias init: U(-1/sqrt(in), 1/sqrt(in)) (not overridden).
    bound_b = 1.0 / math.sqrt(in_features)
    bias = jax.random.uniform(kb, (out_features,),
                              minval=-bound_b, maxval=bound_b, dtype=dtype)
    return weight, bias


if __name__ == "__main__":
    key = jax.random.PRNGKey(0)
    k_x, k_p = jax.random.split(key)

    # Small shapes consistent with a SIREN layer: (batch=2, seq=8, in=32) -> out=64
    B, N, D_in, D_out = 2, 8, 32, 64
    omega_0 = 30.0

    x = jax.random.normal(k_x, (B, N, D_in), dtype=jnp.float32)
    weight, bias = init_sine_layer_params(k_p, D_in, D_out,
                                          is_first=True, omega_0=omega_0)

    y = sine_layer_forward(x, weight, bias, omega_0=omega_0)
    y = jax.block_until_ready(y)

    # Reference check in plain JAX (f32).
    y_ref = jnp.sin(omega_0 * (x.reshape(-1, D_in) @ weight.T + bias)).reshape(B, N, D_out)
    assert y.shape == (B, N, D_out)
    assert jnp.allclose(y, y_ref, atol=2e-4, rtol=2e-4), float(jnp.max(jnp.abs(y - y_ref)))

    print("KERNEL_OK")
</pallas_src>

<mosaic_0001>
module attributes {stable_mosaic.version = 11 : i64} {
  func.func @_sine_layer_kernel(%arg0: i32, %arg1: i32, %arg2: memref<8x128xf32, #tpu.memory_space<vmem>>, %arg3: memref<128x128xf32, #tpu.memory_space<vmem>>, %arg4: memref<1x128xf32, #tpu.memory_space<vmem>>, %arg5: memref<8x128xf32, #tpu.memory_space<vmem>>, %arg6: memref<8x128xf32, #tpu.memory_space<vmem>>) attributes {dimension_semantics = [#tpu.dimension_semantics<parallel>, #tpu.dimension_semantics<arbitrary>], iteration_bounds = array<i64: 2, 1>, scalar_prefetch = 0 : i64, scratch_operands = 1 : i64, tpu.core_type = #tpu.core_type<tc>, window_params = [{transform_indices = @transform_0, window_bounds = array<i64: 8, 128>}, {transform_indices = @transform_1, window_bounds = array<i64: 128, 128>}, {pipeline_mode = #tpu.pipeline_mode<synchronous>, transform_indices = @transform_2, window_bounds = array<i64: 1, 128>}, {transform_indices = @transform_3, window_bounds = array<i64: 8, 128>}]} {
    %c0_i32 = arith.constant 0 : i32
    %0 = arith.cmpi eq, %arg1, %c0_i32 : i32
    %1 = arith.extui %0 : i1 to i32
    %c0_i32_0 = arith.constant 0 : i32
    %2 = arith.cmpi ne, %1, %c0_i32_0 : i32
    scf.if %2 {
      %cst_10 = arith.constant 0.000000e+00 : f32
      %12 = vector.broadcast %cst_10 : f32 to vector<8x128xf32>
      %c0_11 = arith.constant 0 : index
      %c0_12 = arith.constant 0 : index
      %13 = vector.load %arg6[%c0_11, %c0_12] : memref<8x128xf32, #tpu.memory_space<vmem>>, vector<8x128xf32>
      tpu.vector_store %arg6[%c0_11, %c0_12], %12 {strides = array<i32>} : memref<8x128xf32, #tpu.memory_space<vmem>>, vector<8x128xf32>,
    } else {
    }
    %c0 = arith.constant 0 : index
    %c0_1 = arith.constant 0 : index
    %3 = vector.load %arg6[%c0, %c0_1] : memref<8x128xf32, #tpu.memory_space<vmem>>, vector<8x128xf32>
    %c0_2 = arith.constant 0 : index
    %c0_3 = arith.constant 0 : index
    %4 = vector.load %arg2[%c0_2, %c0_3] : memref<8x128xf32, #tpu.memory_space<vmem>>, vector<8x128xf32>
    %c0_4 = arith.constant 0 : index
    %c0_5 = arith.constant 0 : index
    %5 = vector.load %arg3[%c0_4, %c0_5] : memref<128x128xf32, #tpu.memory_space<vmem>>, vector<128x128xf32>
    %cst = arith.constant dense<0.000000e+00> : vector<8x128xf32>
    %6 = tpu.matmul %4, %5, %cst {dimension_numbers = #tpu.dot_dimension_numbers<[1], [0], [0], [1], [0, 0, 1, 1], [], []>} : vector<8x128xf32>, vector<128x128xf32>, vector<8x128xf32> -> vector<8x128xf32>
    %7 = arith.addf %3, %6 : vector<8x128xf32>
    %c0_6 = arith.constant 0 : index
    %c0_7 = arith.constant 0 : index
    %8 = vector.load %arg6[%c0_6, %c0_7] : memref<8x128xf32, #tpu.memory_space<vmem>>, vector<8x128xf32>
    tpu.vector_store %arg6[%c0_6, %c0_7], %7 {strides = array<i32>} : memref<8x128xf32, #tpu.memory_space<vmem>>, vector<8x128xf32>,
    %c0_i32_8 = arith.constant 0 : i32
    %9 = arith.cmpi eq, %arg1, %c0_i32_8 : i32
    %10 = arith.extui %9 : i1 to i32
    %c0_i32_9 = arith.constant 0 : i32
    %11 = arith.cmpi ne, %10, %c0_i32_9 : i32
    scf.if %11 {
      %c0_10 = arith.constant 0 : index
      %c0_11 = arith.constant 0 : index
      %12 = vector.load %arg6[%c0_10, %c0_11] : memref<8x128xf32, #tpu.memory_space<vmem>>, vector<8x128xf32>
      %c0_12 = arith.constant 0 : index
      %c0_13 = arith.constant 0 : index
      %13 = vector.load %arg4[%c0_12, %c0_13] : memref<1x128xf32, #tpu.memory_space<vmem>>, vector<1x128xf32>
      %14 = vector.broadcast %13 : vector<1x128xf32> to vector<8x128xf32>
      %15 = arith.addf %12, %14 : vector<8x128xf32>
      %16 = math.sin %15 : vector<8x128xf32>
      %c0_14 = arith.constant 0 : index
      %c0_15 = arith.constant 0 : index
      %17 = vector.load %arg5[%c0_14, %c0_15] : memref<8x128xf32, #tpu.memory_space<vmem>>, vector<8x128xf32>
      tpu.vector_store %arg5[%c0_14, %c0_15], %16 {strides = array<i32>} : memref<8x128xf32, #tpu.memory_space<vmem>>, vector<8x128xf32>,
    } else {
    }
    return
  }
  func.func @transform_0(%arg0: i32, %arg1: i32) -> (i32, i32) {
    %c0_i32 = arith.constant 0 : i32
    return %arg0, %arg1 : i32, i32
  }
  func.func @transform_1(%arg0: i32, %arg1: i32) -> (i32, i32) {
    %c0_i32 = arith.constant 0 : i32
    %c0_i32_0 = arith.constant 0 : i32
    return %arg1, %c0_i32 : i32, i32
  }
  func.func @transform_2(%arg0: i32, %arg1: i32) -> (i32, i32) {
    %c0_i32 = arith.constant 0 : i32
    %c0_i32_0 = arith.constant 0 : i32
    %c0_i32_1 = arith.constant 0 : i32
    return %c0_i32, %c0_i32_0 : i32, i32
  }
  func.func @transform_3(%arg0: i32, %arg1: i32) -> (i32, i32) {
    %c0_i32 = arith.constant 0 : i32
    %c0_i32_0 = arith.constant 0 : i32
    return %arg0, %c0_i32 : i32, i32
  }
}

</mosaic_0001>

<bundles_post_ra>
// kernel: tpu_custom_call.1
= control target key start
LH: loop header
LB: loop body
LE: loop exit
PB: predicated region body
PF: predicated region fallthrough
CT: control target
= control target key end

     0   :  { %8 = vsyncpa [#allocation4], 0  ;;  %s1034_s0 = inlined_call_operand.hbm [shape: f32[16,128], index: 0, kind: input, shape index: {}]   ;;  %s1035_s1 = inlined_call_operand.hbm [shape: f32[128,128], index: 1, kind: input, shape index: {}]   ;;  %s1036_s2 = inlined_call_operand.vmem [shape: f32[1,128], index: 2, kind: input, shape index: {}]   ;;  %s1037_s3 = inlined_call_operand.hbm [shape: f32[16,128], index: 3, kind: output, shape index: {}]  }
   0x1   :  { %10 = vsyncpa [#allocation4 + $0x1], 0 }
   0x2   :  { %11 = vsyncpa [#allocation7], 0 }
   0x3   :  { %12 = vsyncpa [#allocation5], 0 }
   0x4   :  { %14 = vsyncpa [#allocation5 + $0x1], 0  ;;  %s825_s12 = smov 0   ;;  %s827_s13 = smov 0  }
   0x5   :  { %s829_s14 = smov 0   ;;  %s831_s15 = smov 0  }
   0x6   :  { %s833_s16 = smov 0   ;;  %s835_s17 = smov 0  }
   0x7 LB: > { %s546_s18 = sadd.s32 4294967295, %s793_s17   ;;  %p548_p0 = scmp.ge.s32.totalorder %s793_s17, 1  ;;  %s793_s17 = sphi %s835_s17, %s20_s17   ;;  %s789_s16 = sphi %s833_s16, %s1048_s16   ;;  %s785_s15 = sphi %s831_s15, %s1047_s15   ;;  %s781_s14 = sphi %s829_s14, %s1046_s14   ;;  %s777_s13 = sphi %s827_s13, %s1045_s13   ;;  %s773_s12 = sphi %s825_s12, %s1044_s12  }
   0x8   : > { %p857_p1 = scmp.eq.s32.totalorder %s546_s18, 0  ;;  %p138_p2 = scmp.lt.s32.totalorder %s793_s17, 3 }
   0x9   : > { %s152_s22 = sshll.u32 %s1035_s1, 4  ;;  %s795_s24 = smov [#allocation6]   ;;  %s153_s22 = int_to_ptr.hbm [resolvable:$true] %s152_s22 }
   0xa   : > { %p865_p3 = pnand %p548_p0, %p138_p2  ;;  %s154_s25 = sshll.u32 %s795_s24, 4  ;;  %s155_s25 = int_to_ptr.vmem [resolvable:$true] %s154_s25 }
   0xb   : > { %p550_p6 = scmp.ge.s32.totalorder %s793_s17, 2  ;;  %s796_s26 = smov 128  }
   0xc   : > { %p572_p4 = pneg %p865_p3  ;;  %s797_s27 = smov 8  }
   0xd   : > { %s547_s28 = sadd.s32 4294967294, %s793_s17   ;;  %s32_s29 = sadd.s32 1, %s789_s16 }
   0xe   : > { %p573_p5 = pnand %p572_p4, %p857_p1  ;;  %s41_s30 = sadd.s32 1, %s781_s14 }
   0xf   : > { %p34_p7 = scmp.ge.s32.totalorder %s32_s29, 2  ;;  %p48_p8 = scmp.ne.s32.totalorder %s781_s14, %s777_s13 }
  0x10   : > { %575 = dma.hbm_to_vmem [thread:$0]  (!%p573_p5), %s153_s22, 2048, %s155_s25, [#allocation7], %s796_s26, %s796_s26, %s797_s27  }
  0x11   : > { %p49_p9 = scmp.eq.s32.totalorder %s793_s17, 0  ;;  %p54_p10 = scmp.ne.s32.totalorder %s777_s13, %s773_s12 }
  0x12   : > { %s1050_s29 = smov (%p34_p7, %s32_s29), 0  ;;  %p125_p13 = scmp.eq.s32.totalorder %s546_s18, 1 }
  0x13   : > { %p884_p11 = por %p49_p9, %p48_p8  ;;  %p890_p12 = por %p857_p1, %p54_p10 }
  0x14   : > { %s36_s6 = ssub.s32 %s789_s16, %s1050_s29  ;;  %p131_p2 = scmp.eq.s32.totalorder %s547_s28, 1 }
  0x15   : > { %p39_p0 = scmp.eq.s32.totalorder %s36_s6, 0  ;;  %p896_p4 = por %p125_p13, %p48_p8 }
  0x16   : > { %p585_p5 = scmp.lt.s32.totalorder %s793_s17, 2  ;;  %p904_p7 = por %p131_p2, %p54_p10 }
  0x17   : > { %s902_s8 = scalar_select %p39_p0, %s781_s14, %s41_s30  }
  0x18   : > { %s171_s10 = sand.u32 1, %s781_s14   ;;  %s552_s20 = sshll.u32 %s789_s16, 3 }
  0x19   : > { %s551_s11 = sshll.u32 %s171_s10, 3  ;;  %s180_s18 = scalar_lea.hbm %s1034_s0, %s552_s20 }
  0x1a   : > { %s175_s24 = scalar_lea.vmem [#allocation3], %s551_s11  ;;  %s182_s26 = sshll.u32 %s180_s18, 4  ;;  %s183_s26 = int_to_ptr.hbm [resolvable:$true] %s182_s26 }
  0x1b   : > { %s184_s25 = sshll.u32 %s175_s24, 4  ;;  %p577_p8 = pnand %p585_p5, %p884_p11  ;;  %s185_s25 = int_to_ptr.vmem [resolvable:$true] %s184_s25 }
  0x1c   : > { %s172_s27 = scalar_lea.sflag [#allocation4], %s171_s10  ;;  %193 = sbr.rel (%p865_p3) target bundleno = 295 (0x127), region = 32 }
  0x1d   : > { %579 = dma.hbm_to_vmem [thread:$0]  (!%p577_p8), %s183_s26, 128, %s185_s25, %s172_s27  }
  0x1e   : > { %s918_s28 = sand.u32 (!%p865_p3), 1, %s777_s13  }
  0x1f   : > { %s554_s30 = sshll.u32 (!%p865_p3), %s918_s28, 3  ;;  %s196_s6 = scalar_lea.sflag (!%p865_p3), [#allocation4], %s918_s28 }
  0x20   : > { %s924_s11 = scalar_lea.vmem (!%p865_p3), [#allocation3], %s554_s30 }
  0x21   : > { %760 = dma.done.wait (%p890_p12), %s196_s6, 128  }
  0x22   : > { %762 = vsyncadd (%p890_p12), %s196_s6, 4294967168 }
  0x23   : > { %764 = dma.done.wait (%p857_p1), [#allocation7], 2048  }
  0x24   : > { %766 = vsyncadd (%p857_p1), [#allocation7], 4294965248  ;;  %v251_v0 = vld [vmem:[#allocation6 + $0x78] sm:$0xff]  ;;  %v250_v1 = vld [vmem:[#allocation6 + $0x70] sm:$0xff]  ;;  %v798_v31 = vmov 683565275  }
  0x25   : > { %252 = vmatpush.msra.mxu0 %v251_v0  ;;  %v249_v2 = vld [vmem:[#allocation6 + $0x68] sm:$0xff]  ;;  %v248_v3 = vld [vmem:[#allocation6 + $0x60] sm:$0xff]  ;;  %v247_v4 = vld [vmem:[#allocation6 + $0x58] sm:$0xff]  ;;  %v799_v33 = vmov 2475754826   ;;  %s561_s4 = sshll.u32 %s785_s15, 3 }
  0x26   : > { %v246_v5 = vld [vmem:[#allocation6 + $0x50] sm:$0xff]  ;;  %v245_v6 = vld [vmem:[#allocation6 + $0x48] sm:$0xff]  ;;  %v244_v7 = vld [vmem:[#allocation6 + $0x40] sm:$0xff]  ;;  %v800_v36 = vmov 2131351028   ;;  %s450_s20 = scalar_lea.hbm %s1037_s3, %s561_s4  ;;  %s227_s21 = scalar_lea.vmem [#allocation8], %s554_s30 }
  0x27   : > { %253 = vmatpush.msra.mxu0 %v250_v1  ;;  %v243_v8 = vld [vmem:[#allocation6 + $0x38] sm:$0xff]  ;;  %v242_v9 = vld [vmem:[#allocation6 + $0x30] sm:$0xff]  ;;  %v241_v10 = vld [vmem:[#allocation6 + $0x28] sm:$0xff]  ;;  %v801_v39 = vmov 2102212464   ;;  %s452_s22 = sshll.u32 %s227_s21, 4  ;;  %s453_s22 = int_to_ptr.vmem [resolvable:$true] %s452_s22 }
  0x28   : > { %v240_v11 = vld [vmem:[#allocation6 + $0x20] sm:$0xff]  ;;  %v239_v12 = vld [vmem:[#allocation6 + $0x18] sm:$0xff]  ;;  %v238_v13 = vld [vmem:[#allocation6 + $0x10] sm:$0xff]  ;;  %v802_v42 = vmov 920167782   ;;  %s454_s18 = sshll.u32 %s450_s20, 4  ;;  %s455_s18 = int_to_ptr.hbm [resolvable:$true] %s454_s18 }
  0x29   : > { %254 = vmatpush.msra.mxu0 %v249_v2  ;;  %v237_v14 = vld [vmem:[#allocation6 + $0x8] sm:$0xff]  ;;  %v236_v15 = vld [vmem:[#allocation6] sm:$0xff]  ;;  %v235_v16 = vld [vmem:[%s924_s11] sm:$0xff]  ;;  %v803_v45 = vmov 1326507024   ;;  %s440_s15 = scalar_lea.sflag [#allocation5], %s918_s28 }
  0x2a   : > { %v646_v17 = vld [vmem:[%s1036_s2] ss:$0 sm:$0xff]  ;;  %s721_s24 = sshra.s32 %s455_s18, 4  ;;  %s727_s30 = scalar_lea.hbm %s1037_s3, 16  ;;  %s722_s24 = int_to_ptr.hbm [resolvable:$true] %s721_s24 }
  0x2b   : > { %255 = vmatpush.msra.mxu0 %v248_v3  ;;  %s723_s25 = scalar_lea.hbm %s722_s24, 8  ;;  %p728_p10 = scmp.lt.s32.totalorder %s722_s24, %s1037_s3 }
  0x2c   : > { %p724_p1 = scmp.ne.s32.totalorder %s722_s24, %s723_s25  ;;  %p729_p11 = scmp.lt.s32.totalorder %s727_s30, %s723_s25 }
  0x2d   : > { %256 = vmatpush.msra.mxu0 %v247_v4 }
  0x2e   : > { %p725_p3 = pnand %p724_p1, %p896_p4  ;;  %p730_p12 = por %p729_p11, %p728_p10 }
  0x2f   : > { %257 = vmatpush.msra.mxu0 %v246_v5 }
  0x30   : > { %p726_p9 = pneg %p725_p3 }
  0x31   : > { %258 = vmatpush.msra.mxu0 %v245_v6 }
  0x32   : > { %p731_p13 = pnand %p730_p12, %p726_p9 }
  0x33   : > { %259 = vmatpush.msra.mxu0 %v244_v7 }
  0x35   : > { %260 = vmatpush.msra.mxu0 %v243_v8 }
  0x37   : > { %261 = vmatpush.msra.mxu0 %v242_v9 }
  0x39   : > { %262 = vmatpush.msra.mxu0 %v241_v10 }
  0x3b   : > { %263 = vmatpush.msra.mxu0 %v240_v11 }
  0x3d   : > { %264 = vmatpush.msra.mxu0 %v239_v12 }
  0x3f   : > { %265 = vmatpush.msra.mxu0 %v238_v13 }
  0x41   : > { %266 = vmatpush.msra.mxu0 %v237_v14 }
  0x43   : > { %267 = vmatpush.msra.mxu0 %v236_v15  ;;  %v804_v15 = vmov 0  }
  0x44   : > { %268 = vmatmul.f32.vlgmr.msra.gmra.mxu0 %v235_v16 }
  0xc1   : > { %v269_v18 = vpop.f32.mrf.mxu0 }
  0xc2   : > { %v938_v19 = vadd.f32 %v646_v17, %v269_v18 }
  0xc4   : > { %v286_v20 = vand.u32 2139095040, %v938_v19  ;;  %v283_v23 = vand.u32 2147483647, %v938_v19  ;;  %vm285_vm12 = vcmp.lt.s32.totalorder %v938_v19, 0 }
  0xc6   : > { %v287_v21 = vshrl.u32 %v286_v20, 23  ;;  %v290_v25 = vand.u32 8388607, %v283_v23  ;;  %vm284_vm13 = vcmp.le.f32.partialorder %v283_v23, 0.7853982 }
  0xc8   : > { %v557_v22 = vadd.s32 4294967169, %v287_v21  ;;  %v291_v29 = vor.u32 8388608, %v290_v25 }
  0xca   : > { %v293_v24 = vadd.s32 1, %v557_v22  ;;  %v955_v52 = vshll.u32 %v291_v29, 8 }
  0xcc   : > { %vm294_vm0 = vcmp.gt.s32.totalorder %v293_v24, 0  ;;  %v332_v61 = vand.u32 65535, %v955_v52  ;;  %v333_v62 = vshrl.u32 %v955_v52, 16 }
  0xcd   : > { %v295_v26 = vsel %vm294_vm0, %v293_v24, 0 }
  0xce   : > { %v297_v27 = vand.u32 31, %v295_v26  ;;  %v946_v30 = vshrl.u32 %v295_v26, 5 }
  0xd0   : > { %v944_v28 = vsub.s32 32, %v297_v27  ;;  %v300_v32 = vshll.u32 %v798_v31, %v297_v27  ;;  %v303_v34 = vshll.u32 %v799_v33, %v297_v27  ;;  %v306_v38 = vshll.u32 %v800_v36, %v297_v27 }
  0xd1   : > { %v309_v41 = vshll.u32 %v801_v39, %v297_v27  ;;  %v312_v44 = vshll.u32 %v802_v42, %v297_v27  ;;  %vm315_vm1 = vcmp.lt.s32.totalorder %v946_v30, 1  ;;  %vm318_vm2 = vcmp.lt.s32.totalorder %v946_v30, 4 }
  0xd2   : > { %v301_v35 = vshrl.u32 %v799_v33, %v944_v28  ;;  %v304_v37 = vshrl.u32 %v800_v36, %v944_v28  ;;  %v307_v40 = vshrl.u32 %v801_v39, %v944_v28  ;;  %v310_v43 = vshrl.u32 %v802_v42, %v944_v28 }
  0xd3   : > { %v313_v46 = vshrl.u32 %v803_v45, %v944_v28  ;;  %vm317_vm3 = vcmp.lt.s32.totalorder %v946_v30, 3  ;;  %vm316_vm4 = vcmp.lt.s32.totalorder %v946_v30, 2  ;;  %v299_v26 = vshrl.u32 %v798_v31, %v944_v28 }
  0xd4   : > { %v302_v47 = vor.u32 %v301_v35, %v300_v32  ;;  %v305_v48 = vor.u32 %v304_v37, %v303_v34  ;;  %v308_v49 = vor.u32 %v307_v40, %v306_v38  ;;  %v311_v50 = vor.u32 %v310_v43, %v309_v41 }
  0xd5   : > { %v314_v51 = vor.u32 %v313_v46, %v312_v44 }
  0xd6   : > { %v323_v53 = vsel %vm315_vm1, %v302_v47, %v305_v48  ;;  %v327_v54 = vsel %vm315_vm1, %v305_v48, %v308_v49  ;;  %v324_v55 = vsel %vm318_vm2, %v311_v50, 920167782  ;;  %v320_v22 = vsel %vm318_vm2, %v308_v49, 2102212464 }
  0xd7   : > { %v328_v56 = vsel %vm318_vm2, %v314_v51, 1326507024  ;;  %v325_v57 = vsel %vm317_vm3, %v308_v49, %v324_v55  ;;  %v319_v35 = vsel %vm315_vm1, %v299_v26, %v302_v47  ;;  %v321_v36 = vsel %vm317_vm3, %v305_v48, %v320_v22 }
  0xd8   : > { %v329_v58 = vsel %vm317_vm3, %v311_v50, %v328_v56  ;;  %v326_v59 = vsel %vm316_vm4, %v323_v53, %v325_v57  ;;  %v322_v28 = vsel %vm316_vm4, %v319_v35, %v321_v36  ;;  %vm426_vm1 = vweird.f32 %v938_v19 }
  0xd9   : > { %v330_v60 = vsel %vm316_vm4, %v327_v54, %v329_v58  ;;  %v356_v1 = vand.u32 65535, %v326_v59  ;;  %v357_v2 = vshrl.u32 %v326_v59, 16  ;;  %v376_v44 = vmul.u32 %v955_v52, %v322_v28 }
  0xda   : > { %v334_v63 = vand.u32 65535, %v330_v60  ;;  %v335_v0 = vshrl.u32 %v330_v60, 16 }
  0xdb   : > { %v359_v5 = vmul.u32 %v357_v2, %v332_v61  ;;  %v360_v6 = vmul.u32 %v356_v1, %v333_v62  ;;  %v358_v10 = vmul.u32 %v356_v1, %v332_v61  ;;  %v361_v14 = vmul.u32 %v357_v2, %v333_v62 }
  0xdc   : > { %v337_v3 = vmul.u32 %v335_v0, %v332_v61  ;;  %v338_v4 = vmul.u32 %v334_v63, %v333_v62  ;;  %v336_v7 = vmul.u32 %v334_v63, %v332_v61  ;;  %v339_v9 = vmul.u32 %v335_v0, %v333_v62 }
  0xdd   : > { %v362_v11 = vshll.u32 %v359_v5, 16  ;;  %v364_v17 = vshll.u32 %v360_v6, 16  ;;  %v363_v33 = vshrl.u32 %v359_v5, 16  ;;  %v365_v39 = vshrl.u32 %v360_v6, 16 }
  0xde   : > { %v340_v8 = vshll.u32 %v337_v3, 16  ;;  %v342_v12 = vshll.u32 %v338_v4, 16  ;;  %v341_v27 = vshrl.u32 %v337_v3, 16  ;;  %v343_v37 = vshrl.u32 %v338_v4, 16 }
  0xdf   : > { %vm366_vm6 = vc.u32 %v358_v10, %v362_v11  ;;  %v368_v18 = vadd.s32 %v362_v11, %v358_v10 }
  0xe0   : > { %vm344_vm5 = vc.u32 %v336_v7, %v340_v8  ;;  %v346_v13 = vadd.s32 %v340_v8, %v336_v7  ;;  %v367_v21 = vsel %vm366_vm6, 1, %v804_v15 }
  0xe1   : > { %v345_v16 = vsel %vm344_vm5, 1, %v804_v15  ;;  %v369_v25 = vadd.s32 %v367_v21, %v361_v14  ;;  %vm370_vm8 = vc.u32 %v368_v18, %v364_v17  ;;  %v372_v42 = vadd.s32 %v368_v18, %v364_v17 }
  0xe2   : > { %v347_v20 = vadd.s32 %v345_v16, %v339_v9  ;;  %vm348_vm7 = vc.u32 %v346_v13, %v342_v12  ;;  %v371_v32 = vsel %vm370_vm8, 1, %v804_v15 }
  0xe3   : > { %v349_v24 = vsel %vm348_vm7, 1, %v804_v15  ;;  %v373_v34 = vadd.s32 %v371_v32, %v369_v25 }
  0xe4   : > { %v351_v29 = vadd.s32 %v349_v24, %v347_v20 }
  0xe5   : > { %v374_v40 = vadd.s32 %v373_v34, %v363_v33 }
  0xe6   : > { %v352_v38 = vadd.s32 %v351_v29, %v341_v27 }
  0xe7   : > { %v375_v31 = vadd.s32 %v374_v40, %v365_v39 }
  0xe8   : > { %v353_v41 = vadd.s32 %v352_v38, %v343_v37 }
  0xe9   : > { %v379_v43 = vadd.s32 1, %v375_v31 }
  0xea   : > { %vm378_vm9 = vc.u32 %v353_v41, %v372_v42  ;;  %v377_v30 = vadd.s32 %v372_v42, %v353_v41 }
  0xeb   : > { %v380_v45 = vsel %vm378_vm9, %v379_v43, %v375_v31 }
  0xec   : > { %v381_v46 = vadd.s32 %v380_v45, %v376_v44 }
  0xee   : > { %v382_v47 = vadd.s32 536870912, %v381_v46 }
  0xf0   : > { %v383_v49 = vshrl.u32 %v382_v47, 30 }
  0xf2   : > { %v384_v50 = vshll.u32 %v383_v49, 30  ;;  %v407_v5 = vsub.s32 4, %v383_v49 }
  0xf4   : > { %v385_v48 = vsub.s32 %v381_v46, %v384_v50  ;;  %v408_v10 = vsel %vm285_vm12, %v407_v5, %v383_v49 }
  0xf5   : > { %v410_v13 = vsel %vm284_vm13, 0, %v408_v10 }
  0xf6   : > { %vm386_vm10 = vcmp.lt.s32.totalorder %v385_v48, 0  ;;  %v387_v51 = vsub.s32 0, %v385_v48  ;;  %v427_v18 = vadd.s32 3, %v410_v13 }
  0xf8   : > { %v388_v53 = vsel %vm386_vm10, %v387_v51, %v385_v48  ;;  %v428_v24 = vand.u32 3, %v427_v18 }
  0xf9   : > { %v389_v54 = vclz %v388_v53 }
  0xfa   : > { %vm430_vm14 = vcmp.eq.s32.totalorder %v428_v24, 0  ;;  %vm433_vm15 = vcmp.eq.s32.totalorder %v428_v24, 2  ;;  %vm429_vm0 = vcmp.lt.s32.totalorder %v428_v24, 2 }
  0xfb   : > { %v558_v55 = vadd.s32 4294967294, %v389_v54 }
  0xfd   : > { %vm559_vm11 = vcmp.lt.s32.totalorder %v558_v55, 0 }
  0xfe   : > { %v392_v56 = vsel %vm559_vm11, 0, %v558_v55 }
  0xff   : > { %v393_v57 = vsub.s32 32, %v392_v56  ;;  %v397_v58 = vsub.s32 4294967266, %v392_v56  ;;  %v394_v59 = vshll.u32 %v385_v48, %v392_v56 }
 0x101   : > { %v395_v60 = vshrl.u32 %v377_v30, %v393_v57  ;;  %v398_v61 = vadd.s32 127, %v397_v58 }
 0x103   : > { %v396_v52 = vor.u32 %v395_v60, %v394_v59  ;;  %v399_v62 = vshll.u32 %v398_v61, 23 }
 0x105   : > { %v400_v63 = vor.u32 4788187, %v399_v62  ;;  %v403_v1 = vcvt.s32.f32 %v396_v52 }
 0x107   : > { %v401_v0 = vand.u32 2147483647, %v400_v63 }
 0x109   : > { %v404_v2 = vmul.f32 %v403_v1, %v401_v0 }
 0x10b   : > { %v405_v3 = vxor.u32 2147483648, %v404_v2 }
 0x10d   : > { %v406_v4 = vsel %vm285_vm12, %v405_v3, %v404_v2 }
 0x10e   : > { %v409_v6 = vsel %vm284_vm13, %v938_v19, %v406_v4 }
 0x10f   : > { %v411_v7 = vmul.f32 %v409_v6, %v409_v6 }
 0x111   : > { %v419_v8 = vmul.f32 -0.00019511016, %v411_v7  ;;  %v412_v9 = vmul.f32 -0.001358992, %v411_v7 }
 0x113   : > { %v420_v11 = vadd.f32 0.008332121, %v419_v8  ;;  %v413_v12 = vadd.f32 0.041655596, %v412_v9 }
 0x115   : > { %v421_v14 = vmul.f32 %v420_v11, %v411_v7  ;;  %v414_v15 = vmul.f32 %v413_v12, %v411_v7 }
 0x117   : > { %v422_v16 = vadd.f32 -0.16666654, %v421_v14  ;;  %v415_v17 = vadd.f32 -0.4999988, %v414_v15 }
 0x119   : > { %v423_v20 = vmul.f32 %v422_v16, %v411_v7  ;;  %v416_v23 = vmul.f32 %v415_v17, %v411_v7 }
 0x11b   : > { %v424_v21 = vadd.f32 1.0, %v423_v20  ;;  %v417_v22 = vadd.f32 1.0, %v416_v23 }
 0x11d   : > { %v425_v25 = vmul.f32 %v424_v21, %v409_v6  ;;  %v434_v26 = vxor.u32 2147483648, %v417_v22 }
 0x11f   : > { %v431_v27 = vxor.u32 2147483648, %v425_v25  ;;  %v435_v32 = vsel %vm433_vm15, %v434_v26, %v425_v25 }
 0x121   : > { %v432_v29 = vsel %vm430_vm14, %v417_v22, %v431_v27 }
 0x122   : > { %v436_v33 = vsel %vm429_vm0, %v432_v29, %v435_v32 }
 0x123   : > { %v437_v34 = vsel %vm426_vm1, nan, %v436_v33 }
 0x124   : > { %438 = vst [vmem:[%s227_s21] sm:$0xff] %v437_v34 }
 0x125   : > { %734 = shalt.err (!%p731_p13)
}
 0x126   : > { %570 = dma.vmem_to_hbm [thread:$0]  (%p896_p4), %s453_s22, 128, %s455_s18, %s440_s15  }
 0x127 PF: > { %s466_s28 = sand.u32 1, %s773_s12   ;;  %p581_p0 = pnand %p550_p6, %p904_p7 }
 0x128   : > { %s467_s19 = scalar_lea.sflag [#allocation5], %s466_s28 }
 0x129   : > { %p582_p2 = pneg %p581_p0 }
 0x12b   : > { %768 = dma.done.wait (%p582_p2), %s467_s19, 128  }
 0x12c   : > { %770 = vsyncadd (%p582_p2), %s467_s19, 4294967168  ;;  %s20_s17 = sadd.s32 1, %s793_s17   ;;  %s1044_s12 = smov %s777_s13 }
 0x12d   : > { %p17_p5 = scmp.ge.s32.totalorder %s20_s17, 4   ;;  %s1045_s13 = smov %s781_s14 }
 0x12e   : > { %s1046_s14 = smov %s902_s8  ;;  %s1047_s15 = smov %s789_s16 }
 0x12f   : > { %s1048_s16 = smov %s1050_s29  ;;  %19 = sbr.rel (!%p17_p5) target bundleno = 7 (0x7), region = 90 }
 0x134   :  { %473 = vsyncpa [#allocation4], 1 }
 0x135   :  { %475 = vsyncpa [#allocation4 + $0x1], 1 }
 0x136   :  { %476 = vsyncpa [#allocation7], 1 }
 0x137   :  { %477 = vsyncpa [#allocation5], 1 }
 0x138   :  { %479 = vsyncpa [#allocation5 + $0x1], 1 }

</bundles_post_ra>
